<compile_context>
chip_gen: v6e
topology: v6e:2x2x1
jax: 0.10.0
libtpu: 0.0.40
codegen_flags: <defaults>
</compile_context>

<pallas_src>
import jax
import jax.numpy as jnp
import numpy as np
from jax.experimental import pallas as pl
from jax.experimental.pallas import tpu as pltpu


# ----------------------------- hyperparameters ------------------------------
BATCH = 2
IN_CHANNELS = 4            # fixed by the module
FRAGMENT_LENGTH = 16
CONV_LAYERS_NUM = 8        # out channels of conv1
CONV_KERNEL_SIZE = 3
POOL_KERNEL_SIZE = 2       # kernel assumes 2 (even/odd window split)
POOL_STRIDE = 2
FC_SIZE = 32
CONV_STRIDE = 1
CONV_DILATION = 1
POOL_DILATION = 1

L_OUT = (FRAGMENT_LENGTH - CONV_DILATION * (CONV_KERNEL_SIZE - 1) - 1) // CONV_STRIDE + 1
P_OUT = (L_OUT - POOL_DILATION * (POOL_KERNEL_SIZE - 1) - 1) // POOL_STRIDE + 1
INPUT_FC = P_OUT * CONV_LAYERS_NUM          # 56
CIN_L = IN_CHANNELS * FRAGMENT_LENGTH       # 64

LANES = 128                                 # padded lane width everywhere
NEG_BIG = -1.0e30                           # softmax mask for padded classes

# slab row layout (all offsets are multiples of 8 -> tile-aligned slices)
ROW_W_EVEN = 0                              # [64, 128]  conv taps, even offset
ROW_W_ODD = ROW_W_EVEN + CIN_L              # [64, 128]  conv taps, odd offset
ROW_W1 = ROW_W_ODD + CIN_L                  # [128, 128] fc1^T padded
ROW_W2 = ROW_W1 + LANES                     # [128, 128] fc2^T padded
ROW_BIAS = ROW_W2 + LANES                   # [8, 128]   bc / b1 / b2 / mask / pad
SLAB_ROWS = ROW_BIAS + 8                    # 392


# ------------------------------ Pallas kernel --------------------------------
def cnn_fused_kernel(x_ref, p_ref, out_ref):
    """One batch tile of the whole forward pass.

    x_ref : [TB, CIN_L]       flattened input tile
    p_ref : [SLAB_ROWS, 128]  packed parameter slab (VMEM-resident)
    out_ref:[TB, 128]         softmax probs in lanes 0..1, zeros elsewhere
    """
    x = x_ref[...]
    w_even = p_ref[ROW_W_EVEN:ROW_W_EVEN + CIN_L, :]
    w_odd = p_ref[ROW_W_ODD:ROW_W_ODD + CIN_L, :]
    w1 = p_ref[ROW_W1:ROW_W1 + LANES, :]
    w2 = p_ref[ROW_W2:ROW_W2 + LANES, :]
    bc = p_ref[ROW_BIAS + 0:ROW_BIAS + 1, :]      # conv bias (flatten order)
    b1 = p_ref[ROW_BIAS + 1:ROW_BIAS + 2, :]
    b2 = p_ref[ROW_BIAS + 2:ROW_BIAS + 3, :]
    msk = p_ref[ROW_BIAS + 3:ROW_BIAS + 4, :]     # 0 on real classes, -1e30 pad

    # conv1d at the even / odd pool offsets as two matmuls; ReLU + MaxPool1d(2,2)
    # is max over the two candidates (ReLU is monotone, bias shared).
    r_even = jnp.dot(x, w_even, preferred_element_type=jnp.float32)
    r_odd = jnp.dot(x, w_odd, preferred_element_type=jnp.float32)
    pooled = jnp.maximum(jnp.maximum(r_even, r_odd) + bc, 0.0)   # [TB, 128]

    # dropout == identity (inference); fc1 + ReLU
    h = jnp.maximum(
        jnp.dot(pooled, w1, preferred_element_type=jnp.float32) + b1, 0.0)
    # dropout == identity; fc2 + ReLU
    o = jnp.maximum(
        jnp.dot(h, w2, preferred_element_type=jnp.float32) + b2, 0.0)

    # softmax(dim=1) over the 2 real classes; padded lanes get -1e30 -> exp == 0
    logits = o + msk
    m = jnp.max(logits, axis=-1, keepdims=True)
    e = jnp.exp(logits - m)
    s = jnp.sum(e, axis=-1, keepdims=True)
    out_ref[...] = e / s                           # exact divide (review note)


# --------------------------- parameter preprocessing -------------------------
def prepare_params(wconv, bconv, w1, b1, w2, b2):
    """One-time (outside jit) repack of PyTorch-layout parameters into a slab.

    Column (c*P_OUT + p) of the even/odd conv matrices holds the conv1d taps
    for output channel c at pool window p, matching PyTorch's channel-major
    .view(-1, input_fc) flatten order.  All widths padded to 128 with zeros.
    """
    w_np = np.asarray(wconv, dtype=np.float32)     # [C_out, C_in, K]
    w_eo = np.zeros((POOL_KERNEL_SIZE, CIN_L, LANES), np.float32)
    for off in range(POOL_KERNEL_SIZE):            # even / odd pool offset
        for c in range(CONV_LAYERS_NUM):
            for p in range(P_OUT):
                conv_pos = p * POOL_STRIDE + off * POOL_DILATION
                col = c * P_OUT + p
                for i in range(IN_CHANNELS):
                    for k in range(CONV_KERNEL_SIZE):
                        row = (i * FRAGMENT_LENGTH
                               + conv_pos * CONV_STRIDE
                               + k * CONV_DILATION)
                        w_eo[off, row, col] = w_np[c, i, k]

    w1p = np.zeros((LANES, LANES), np.float32)
    w1p[:INPUT_FC, :FC_SIZE] = np.asarray(w1, np.float32).T
    w2p = np.zeros((LANES, LANES), np.float32)
    w2p[:FC_SIZE, :2] = np.asarray(w2, np.float32).T

    bias_blk = np.zeros((8, LANES), np.float32)
    bias_blk[0, :INPUT_FC] = np.repeat(np.asarray(bconv, np.float32), P_OUT)
    bias_blk[1, :FC_SIZE] = np.asarray(b1, np.float32)
    bias_blk[2, :2] = np.asarray(b2, np.float32)
    bias_blk[3, 2:] = NEG_BIG                      # softmax lane mask

    slab = np.concatenate([w_eo[0], w_eo[1], w1p, w2p, bias_blk], axis=0)
    assert slab.shape == (SLAB_ROWS, LANES)
    return jnp.asarray(slab)


# --------------------------------- forward -----------------------------------
@jax.jit
def cnn_forward(x, slab):
    """x: [B, 4, FRAGMENT_LENGTH] float32 -> [B, 2] softmax probabilities."""
    b = x.shape[0]
    xf = x.reshape(b, CIN_L)                       # free contiguous reshape

    # batch tile: 256 rows for large batches, otherwise the whole (8-padded) batch
    tb = 256 if b >= 256 else max(8, ((b + 7) // 8) * 8)
    b_pad = ((b + tb - 1) // tb) * tb
    if b_pad != b:
        xf = jnp.pad(xf, ((0, b_pad - b), (0, 0)))

    out = pl.pallas_call(
        cnn_fused_kernel,
        out_shape=jax.ShapeDtypeStruct((b_pad, LANES), jnp.float32),
        grid_spec=pltpu.PrefetchScalarGridSpec(
            num_scalar_prefetch=0,
            grid=(b_pad // tb,),
            in_specs=[
                pl.BlockSpec((tb, CIN_L), lambda i: (i, 0)),        # x tile
                pl.BlockSpec((SLAB_ROWS, LANES), lambda i: (0, 0)), # resident
            ],
            out_specs=pl.BlockSpec((tb, LANES), lambda i: (i, 0)),
        ),
        compiler_params=pltpu.CompilerParams(
            dimension_semantics=("parallel",)),
    )(xf, slab)
    return out[:b, :2]


# ------------------------- pure-JAX reference check -------------------------
def reference_forward(x, wconv, bconv, w1, b1, w2, b2):
    conv = jax.lax.conv_general_dilated(
        x, wconv, window_strides=(CONV_STRIDE,), padding="VALID",
        rhs_dilation=(CONV_DILATION,),
        dimension_numbers=("NCH", "OIH", "NCH"))
    conv = conv + bconv[None, :, None]
    r = jnp.maximum(conv, 0.0)
    pooled = jax.lax.reduce_window(
        r, -jnp.inf, jax.lax.max,
        (1, 1, POOL_KERNEL_SIZE), (1, 1, POOL_STRIDE), "VALID")
    flat = pooled.reshape(x.shape[0], INPUT_FC)
    h = jnp.maximum(flat @ w1.T + b1, 0.0)
    o = jnp.maximum(h @ w2.T + b2, 0.0)
    return jax.nn.softmax(o, axis=1)


# --------------------------------- main --------------------------------------
def _uniform(key, shape, bound):
    return jax.random.uniform(key, shape, jnp.float32, -bound, bound)


if __name__ == "__main__":
    key = jax.random.PRNGKey(0)
    kx, kwc, kbc, kw1, kb1, kw2, kb2, kxb = jax.random.split(key, 8)

    x = jax.random.normal(kx, (BATCH, IN_CHANNELS, FRAGMENT_LENGTH), jnp.float32)

    # deterministic parameter init (PyTorch-style uniform(-1/sqrt(fan_in), ...))
    bc_conv = 1.0 / (IN_CHANNELS * CONV_KERNEL_SIZE) ** 0.5
    wconv = _uniform(kwc, (CONV_LAYERS_NUM, IN_CHANNELS, CONV_KERNEL_SIZE), bc_conv)
    bconv = _uniform(kbc, (CONV_LAYERS_NUM,), bc_conv)
    bd1 = 1.0 / INPUT_FC ** 0.5
    w1 = _uniform(kw1, (FC_SIZE, INPUT_FC), bd1)
    b1 = _uniform(kb1, (FC_SIZE,), bd1)
    bd2 = 1.0 / FC_SIZE ** 0.5
    w2 = _uniform(kw2, (2, FC_SIZE), bd2)
    b2 = _uniform(kb2, (2,), bd2)

    # one-time parameter repack into a single slab (outside the jitted forward)
    slab = prepare_params(wconv, bconv, w1, b1, w2, b2)

    # small-batch run (the required example)
    out = jax.block_until_ready(cnn_forward(x, slab))
    ref = reference_forward(x, wconv, bconv, w1, b1, w2, b2)
    assert out.shape == (BATCH, 2)
    assert jnp.allclose(out, ref, atol=2e-3, rtol=2e-3), (out, ref)
    assert jnp.allclose(jnp.sum(out, axis=1), 1.0, atol=1e-5)

    # also exercise the batched parallel-grid path (grid > 1, batch padding)
    xb = jax.random.normal(kxb, (300, IN_CHANNELS, FRAGMENT_LENGTH), jnp.float32)
    outb = jax.block_until_ready(cnn_forward(xb, slab))
    refb = reference_forward(xb, wconv, bconv, w1, b1, w2, b2)
    assert outb.shape == (300, 2)
    assert jnp.allclose(outb, refb, atol=2e-3, rtol=2e-3)

    print("KERNEL_OK")
</pallas_src>

<mosaic_0001>
module attributes {stable_mosaic.version = 11 : i64} {
  func.func @cnn_fused_kernel(%arg0: i32, %arg1: memref<8x64xf32, #tpu.memory_space<vmem>>, %arg2: memref<392x128xf32, #tpu.memory_space<vmem>>, %arg3: memref<8x128xf32, #tpu.memory_space<vmem>>) attributes {dimension_semantics = [#tpu.dimension_semantics<parallel>], iteration_bounds = array<i64: 1>, scalar_prefetch = 0 : i64, scratch_operands = 0 : i64, tpu.core_type = #tpu.core_type<tc>, window_params = [{transform_indices = @transform_0, window_bounds = array<i64: 8, 64>}, {pipeline_mode = #tpu.pipeline_mode<synchronous>, transform_indices = @transform_1, window_bounds = array<i64: 392, 128>}, {transform_indices = @transform_2, window_bounds = array<i64: 8, 128>}]} {
    %c0 = arith.constant 0 : index
    %c0_0 = arith.constant 0 : index
    %0 = vector.load %arg1[%c0, %c0_0] : memref<8x64xf32, #tpu.memory_space<vmem>>, vector<8x64xf32>
    %c0_1 = arith.constant 0 : index
    %c0_2 = arith.constant 0 : index
    %1 = vector.load %arg2[%c0_1, %c0_2] : memref<392x128xf32, #tpu.memory_space<vmem>>, vector<64x128xf32>
    %c64 = arith.constant 64 : index
    %c0_3 = arith.constant 0 : index
    %2 = vector.load %arg2[%c64, %c0_3] : memref<392x128xf32, #tpu.memory_space<vmem>>, vector<64x128xf32>
    %c128 = arith.constant 128 : index
    %c0_4 = arith.constant 0 : index
    %3 = vector.load %arg2[%c128, %c0_4] : memref<392x128xf32, #tpu.memory_space<vmem>>, vector<128x128xf32>
    %c256 = arith.constant 256 : index
    %c0_5 = arith.constant 0 : index
    %4 = vector.load %arg2[%c256, %c0_5] : memref<392x128xf32, #tpu.memory_space<vmem>>, vector<128x128xf32>
    %c384 = arith.constant 384 : index
    %c0_6 = arith.constant 0 : index
    %5 = vector.load %arg2[%c384, %c0_6] : memref<392x128xf32, #tpu.memory_space<vmem>>, vector<1x128xf32>
    %c385 = arith.constant 385 : index
    %c0_7 = arith.constant 0 : index
    %6 = vector.load %arg2[%c385, %c0_7] : memref<392x128xf32, #tpu.memory_space<vmem>>, vector<1x128xf32>
    %c386 = arith.constant 386 : index
    %c0_8 = arith.constant 0 : index
    %7 = vector.load %arg2[%c386, %c0_8] : memref<392x128xf32, #tpu.memory_space<vmem>>, vector<1x128xf32>
    %c387 = arith.constant 387 : index
    %c0_9 = arith.constant 0 : index
    %8 = vector.load %arg2[%c387, %c0_9] : memref<392x128xf32, #tpu.memory_space<vmem>>, vector<1x128xf32>
    %cst = arith.constant dense<0.000000e+00> : vector<8x128xf32>
    %9 = tpu.matmul %0, %1, %cst {dimension_numbers = #tpu.dot_dimension_numbers<[1], [0], [0], [1], [0, 0, 1, 1], [], []>} : vector<8x64xf32>, vector<64x128xf32>, vector<8x128xf32> -> vector<8x128xf32>
    %cst_10 = arith.constant dense<0.000000e+00> : vector<8x128xf32>
    %10 = tpu.matmul %0, %2, %cst_10 {dimension_numbers = #tpu.dot_dimension_numbers<[1], [0], [0], [1], [0, 0, 1, 1], [], []>} : vector<8x64xf32>, vector<64x128xf32>, vector<8x128xf32> -> vector<8x128xf32>
    %11 = arith.maximumf %9, %10 : vector<8x128xf32>
    %12 = vector.broadcast %5 : vector<1x128xf32> to vector<8x128xf32>
    %13 = arith.addf %11, %12 : vector<8x128xf32>
    %cst_11 = arith.constant 0.000000e+00 : f32
    %14 = vector.broadcast %cst_11 : f32 to vector<8x128xf32>
    %15 = arith.maximumf %13, %14 : vector<8x128xf32>
    %cst_12 = arith.constant dense<0.000000e+00> : vector<8x128xf32>
    %16 = tpu.matmul %15, %3, %cst_12 {dimension_numbers = #tpu.dot_dimension_numbers<[1], [0], [0], [1], [0, 0, 1, 1], [], []>} : vector<8x128xf32>, vector<128x128xf32>, vector<8x128xf32> -> vector<8x128xf32>
    %17 = vector.broadcast %6 : vector<1x128xf32> to vector<8x128xf32>
    %18 = arith.addf %16, %17 : vector<8x128xf32>
    %cst_13 = arith.constant 0.000000e+00 : f32
    %19 = vector.broadcast %cst_13 : f32 to vector<8x128xf32>
    %20 = arith.maximumf %18, %19 : vector<8x128xf32>
    %cst_14 = arith.constant dense<0.000000e+00> : vector<8x128xf32>
    %21 = tpu.matmul %20, %4, %cst_14 {dimension_numbers = #tpu.dot_dimension_numbers<[1], [0], [0], [1], [0, 0, 1, 1], [], []>} : vector<8x128xf32>, vector<128x128xf32>, vector<8x128xf32> -> vector<8x128xf32>
    %22 = vector.broadcast %7 : vector<1x128xf32> to vector<8x128xf32>
    %23 = arith.addf %21, %22 : vector<8x128xf32>
    %cst_15 = arith.constant 0.000000e+00 : f32
    %24 = vector.broadcast %cst_15 : f32 to vector<8x128xf32>
    %25 = arith.maximumf %23, %24 : vector<8x128xf32>
    %26 = vector.broadcast %8 : vector<1x128xf32> to vector<8x128xf32>
    %27 = arith.addf %25, %26 : vector<8x128xf32>
    %cst_16 = arith.constant dense<0xFF800000> : vector<8xf32>
    %28 = vector.multi_reduction <maximumf>, %27, %cst_16 [1] : vector<8x128xf32> to vector<8xf32>
    %29 = vector.shape_cast %28 : vector<8xf32> to vector<8x1xf32>
    %30 = vector.broadcast %29 : vector<8x1xf32> to vector<8x128xf32>
    %31 = arith.subf %27, %30 : vector<8x128xf32>
    %32 = math.exp %31 : vector<8x128xf32>
    %cst_17 = arith.constant dense<0.000000e+00> : vector<8xf32>
    %33 = vector.multi_reduction <add>, %32, %cst_17 [1] : vector<8x128xf32> to vector<8xf32>
    %34 = vector.shape_cast %33 : vector<8xf32> to vector<8x1xf32>
    %35 = vector.broadcast %34 : vector<8x1xf32> to vector<8x128xf32>
    %36 = arith.divf %32, %35 : vector<8x128xf32>
    %c0_18 = arith.constant 0 : index
    %c0_19 = arith.constant 0 : index
    %37 = vector.load %arg3[%c0_18, %c0_19] : memref<8x128xf32, #tpu.memory_space<vmem>>, vector<8x128xf32>
    tpu.vector_store %arg3[%c0_18, %c0_19], %36 {strides = array<i32>} : memref<8x128xf32, #tpu.memory_space<vmem>>, vector<8x128xf32>,
    return
  }
  func.func @transform_0(%arg0: i32) -> (i32, i32) {
    %c0_i32 = arith.constant 0 : i32
    %c0_i32_0 = arith.constant 0 : i32
    return %arg0, %c0_i32 : i32, i32
  }
  func.func @transform_1(%arg0: i32) -> (i32, i32) {
    %c0_i32 = arith.constant 0 : i32
    %c0_i32_0 = arith.constant 0 : i32
    %c0_i32_1 = arith.constant 0 : i32
    return %c0_i32, %c0_i32_0 : i32, i32
  }
  func.func @transform_2(%arg0: i32) -> (i32, i32) {
    %c0_i32 = arith.constant 0 : i32
    %c0_i32_0 = arith.constant 0 : i32
    return %arg0, %c0_i32 : i32, i32
  }
}

</mosaic_0001>

<bundles_post_ra>
// kernel: cnn_forward.1
= control target key start
LH: loop header
LB: loop body
LE: loop exit
PB: predicated region body
PF: predicated region fallthrough
CT: control target
= control target key end

     0   :  { %7 = vsyncpa [#allocation3], 0  ;;  %s596_s9 = smov [#allocation2]   ;;  %s681_s0 = inlined_call_operand.vmem [shape: f32[8,64], index: 0, kind: input, shape index: {}]   ;;  %s682_s1 = inlined_call_operand.hbm [shape: f32[392,128], index: 1, kind: input, shape index: {}]   ;;  %s683_s2 = inlined_call_operand.vmem [shape: f32[8,128], index: 2, kind: output, shape index: {}]  }
   0x1   :  { %s15_s10 = sshll.u32 %s596_s9, 4  ;;  %s16_s10 = int_to_ptr.vmem [resolvable:$true] %s15_s10 }
   0x2   :  { %s582_s11 = scalar_lea.vmem %s16_s10, 6272  ;;  %p587_p1 = scmp.lt.s32.totalorder %s16_s10, %s16_s10 }
   0x3   :  { %p583_p0 = scmp.ne.s32.totalorder %s16_s10, %s582_s11  ;;  %p588_p2 = scmp.lt.s32.totalorder %s582_s11, %s582_s11 }
   0x5   :  { %p589_p3 = por %p588_p2, %p587_p1 }
   0x7   :  { %p590_p4 = pnand %p589_p3, %p583_p0 }
   0x9   :  { %593 = shalt.err (!%p590_p4)
}
   0xa   :  { %s597_s12 = smov 128   ;;  %s598_s13 = smov 8  }
   0xb   :  { %21 = dma.hbm_to_vmem [thread:$0]  %s682_s1, 6272, %s16_s10, [#allocation3], %s597_s12, %s597_s12, %s598_s13  }
   0xc   :  { %594 = dma.done.wait [#allocation3], 6272  }
   0xd   :  { %595 = vsyncadd [#allocation3], 4294961024  ;;  %v599_v0 = vmov 0.0   ;;  %vm600_vm0 = vmmov 0   ;;  %v33_v1 = vld [vmem:[#allocation2 + $0x38] sm:$0xff]  ;;  %v32_v3 = vld [vmem:[#allocation2 + $0x30] sm:$0xff] }
   0xe   :  { %457 = vmatprep.subr.mxu0 %v599_v0  ;;  %476 = vmatprep.subr.mxu1 %v599_v0  ;;  %v41_v2 = vld [vmem:[#allocation2 + $0x78] sm:$0xff]  ;;  %v40_v4 = vld [vmem:[#allocation2 + $0x70] sm:$0xff]  ;;  %v31_v5 = vld [vmem:[#allocation2 + $0x28] sm:$0xff]  ;;  %vm78_vm1 = vcmask 523264  }
   0xf   :  { %473 = vmatprep.mubr.msk.f32.mxu0 %vm600_vm0, %v599_v0  ;;  %492 = vmatprep.mubr.msk.f32.mxu1 %vm600_vm0, %v599_v0  ;;  %v39_v6 = vld [vmem:[#allocation2 + $0x68] sm:$0xff]  ;;  %v30_v7 = vld [vmem:[#allocation2 + $0x20] sm:$0xff]  ;;  %v29_v9 = vld [vmem:[#allocation2 + $0x18] sm:$0xff] }
  0x10   :  { %458 = vmatpush3.msra.mxu0 %v33_v1  ;;  %477 = vmatpush3.msra.mxu1 %v41_v2  ;;  %v38_v8 = vld [vmem:[#allocation2 + $0x60] sm:$0xff]  ;;  %v37_v10 = vld [vmem:[#allocation2 + $0x58] sm:$0xff]  ;;  %v28_v11 = vld [vmem:[#allocation2 + $0x10] sm:$0xff] }
  0x11   :  { %459 = vmatprep.subr.mxu0 %v599_v0  ;;  %478 = vmatprep.subr.mxu1 %v599_v0  ;;  %v36_v12 = vld [vmem:[#allocation2 + $0x50] sm:$0xff]  ;;  %v27_v13 = vld [vmem:[#allocation2 + $0x8] sm:$0xff]  ;;  %v26_v15 = vld [vmem:[#allocation2] sm:$0xff] }
  0x12   :  { %460 = vmatpush3.msra.mxu0 %v32_v3  ;;  %479 = vmatpush3.msra.mxu1 %v40_v4  ;;  %v35_v14 = vld [vmem:[#allocation2 + $0x48] sm:$0xff]  ;;  %v34_v16 = vld [vmem:[#allocation2 + $0x40] sm:$0xff]  ;;  %v57_v18 = vld [vmem:[#allocation2 + $0xf8] sm:$0xff] }
  0x13   :  { %461 = vmatprep.subr.mxu0 %v599_v0  ;;  %480 = vmatprep.subr.mxu1 %v599_v0  ;;  %v25_v17 = vld [vmem:[%s681_s0] sm:$0xff]  ;;  %v56_v19 = vld [vmem:[#allocation2 + $0xf0] sm:$0xff]  ;;  %v55_v20 = vld [vmem:[#allocation2 + $0xe8] sm:$0xff] }
  0x14   :  { %462 = vmatpush3.msra.mxu0 %v31_v5  ;;  %481 = vmatpush3.msra.mxu1 %v39_v6  ;;  %v54_v21 = vld [vmem:[#allocation2 + $0xe0] sm:$0xff]  ;;  %v53_v22 = vld [vmem:[#allocation2 + $0xd8] sm:$0xff]  ;;  %v52_v23 = vld [vmem:[#allocation2 + $0xd0] sm:$0xff] }
  0x15   :  { %463 = vmatprep.subr.mxu0 %v599_v0  ;;  %482 = vmatprep.subr.mxu1 %v599_v0  ;;  %v51_v24 = vld [vmem:[#allocation2 + $0xc8] sm:$0xff]  ;;  %v50_v25 = vld [vmem:[#allocation2 + $0xc0] sm:$0xff]  ;;  %v49_v26 = vld [vmem:[#allocation2 + $0xb8] sm:$0xff] }
  0x16   :  { %464 = vmatpush3.msra.mxu0 %v30_v7  ;;  %483 = vmatpush3.msra.mxu1 %v38_v8  ;;  %v48_v27 = vld [vmem:[#allocation2 + $0xb0] sm:$0xff]  ;;  %v47_v28 = vld [vmem:[#allocation2 + $0xa8] sm:$0xff]  ;;  %v46_v29 = vld [vmem:[#allocation2 + $0xa0] sm:$0xff] }
  0x17   :  { %465 = vmatprep.subr.mxu0 %v599_v0  ;;  %484 = vmatprep.subr.mxu1 %v599_v0  ;;  %v45_v30 = vld [vmem:[#allocation2 + $0x98] sm:$0xff]  ;;  %v44_v31 = vld [vmem:[#allocation2 + $0x90] sm:$0xff]  ;;  %v43_v32 = vld [vmem:[#allocation2 + $0x88] sm:$0xff] }
  0x18   :  { %466 = vmatpush3.msra.mxu0 %v29_v9  ;;  %485 = vmatpush3.msra.mxu1 %v37_v10  ;;  %v42_v33 = vld [vmem:[#allocation2 + $0x80] sm:$0xff]  ;;  %v73_v34 = vld [vmem:[#allocation2 + $0x178] sm:$0xff]  ;;  %v72_v35 = vld [vmem:[#allocation2 + $0x170] sm:$0xff] }
  0x19   :  { %467 = vmatprep.subr.mxu0 %v599_v0  ;;  %486 = vmatprep.subr.mxu1 %v599_v0  ;;  %v71_v36 = vld [vmem:[#allocation2 + $0x168] sm:$0xff]  ;;  %v70_v37 = vld [vmem:[#allocation2 + $0x160] sm:$0xff]  ;;  %v69_v38 = vld [vmem:[#allocation2 + $0x158] sm:$0xff] }
  0x1a   :  { %468 = vmatpush3.msra.mxu0 %v28_v11  ;;  %487 = vmatpush3.msra.mxu1 %v36_v12  ;;  %v68_v39 = vld [vmem:[#allocation2 + $0x150] sm:$0xff]  ;;  %v67_v40 = vld [vmem:[#allocation2 + $0x148] sm:$0xff]  ;;  %v66_v41 = vld [vmem:[#allocation2 + $0x140] sm:$0xff] }
  0x1b   :  { %469 = vmatprep.subr.mxu0 %v599_v0  ;;  %488 = vmatprep.subr.mxu1 %v599_v0  ;;  %v65_v42 = vld [vmem:[#allocation2 + $0x138] sm:$0xff]  ;;  %v64_v43 = vld [vmem:[#allocation2 + $0x130] sm:$0xff]  ;;  %v63_v44 = vld [vmem:[#allocation2 + $0x128] sm:$0xff] }
  0x1c   :  { %470 = vmatpush3.msra.mxu0 %v27_v13  ;;  %489 = vmatpush3.msra.mxu1 %v35_v14  ;;  %v62_v45 = vld [vmem:[#allocation2 + $0x120] sm:$0xff]  ;;  %v61_v46 = vld [vmem:[#allocation2 + $0x118] sm:$0xff]  ;;  %v60_v55 = vld [vmem:[#allocation2 + $0x110] sm:$0xff] }
  0x1d   :  { %471 = vmatprep.subr.mxu0 %v599_v0  ;;  %490 = vmatprep.subr.mxu1 %v599_v0  ;;  %v401_v48 = vld [vmem:[#allocation2 + $0x180] ss:$0 sm:$0xff]  ;;  %v59_v56 = vld [vmem:[#allocation2 + $0x108] sm:$0xff]  ;;  %v402_v58 = vld [vmem:[#allocation2 + $0x181] ss:$0 sm:$0xff] }
  0x1e   :  { %472 = vmatpush3.msra.mxu0 %v26_v15  ;;  %491 = vmatpush3.msra.mxu1 %v34_v16  ;;  %v58_v57 = vld [vmem:[#allocation2 + $0x100] sm:$0xff] }
  0x1f   :  { %474 = vmatmul.mubr.msk.f32.vlgmr.msra.gmra.mxu0 %vm78_vm1, %v25_v17  ;;  %493 = vmatmul.mubr.msk.f32.vlgmr.msra.gmra.mxu1 %vm78_vm1, %v25_v17  ;;  %v403_v63 = vld [vmem:[#allocation2 + $0x182] ss:$0 sm:$0xff]  ;;  %v404_v4 = vld [vmem:[#allocation2 + $0x183] ss:$0 sm:$0xff] }
  0x20   :  { %495 = vmatprep.subr.mxu0 %v599_v0  ;;  %527 = vmatprep.mubr.msk.f32.mxu0 %vm600_vm0, %v599_v0 }
  0x21   :  { %496 = vmatpush3.msra.mxu0 %v57_v18  ;;  %530 = vmatprep.subr.mxu1 %v599_v0 }
  0x22   :  { %497 = vmatprep.subr.mxu0 %v599_v0  ;;  %562 = vmatprep.mubr.msk.f32.mxu1 %vm600_vm0, %v599_v0 }
  0x23   :  { %498 = vmatpush3.msra.mxu0 %v56_v19  ;;  %531 = vmatpush3.msra.mxu1 %v73_v34 }
  0x24   :  { %499 = vmatprep.subr.mxu0 %v599_v0  ;;  %532 = vmatprep.subr.mxu1 %v599_v0 }
  0x25   :  { %500 = vmatpush3.msra.mxu0 %v55_v20  ;;  %533 = vmatpush3.msra.mxu1 %v72_v35 }
  0x26   :  { %501 = vmatprep.subr.mxu0 %v599_v0  ;;  %534 = vmatprep.subr.mxu1 %v599_v0 }
  0x27   :  { %502 = vmatpush3.msra.mxu0 %v54_v21  ;;  %535 = vmatpush3.msra.mxu1 %v71_v36 }
  0x28   :  { %503 = vmatprep.subr.mxu0 %v599_v0  ;;  %536 = vmatprep.subr.mxu1 %v599_v0 }
  0x29   :  { %504 = vmatpush3.msra.mxu0 %v53_v22  ;;  %537 = vmatpush3.msra.mxu1 %v70_v37 }
  0x2a   :  { %505 = vmatprep.subr.mxu0 %v599_v0  ;;  %538 = vmatprep.subr.mxu1 %v599_v0 }
  0x2b   :  { %506 = vmatpush3.msra.mxu0 %v52_v23  ;;  %539 = vmatpush3.msra.mxu1 %v69_v38 }
  0x2c   :  { %507 = vmatprep.subr.mxu0 %v599_v0  ;;  %540 = vmatprep.subr.mxu1 %v599_v0 }
  0x2d   :  { %508 = vmatpush3.msra.mxu0 %v51_v24  ;;  %541 = vmatpush3.msra.mxu1 %v68_v39 }
  0x2e   :  { %509 = vmatprep.subr.mxu0 %v599_v0  ;;  %542 = vmatprep.subr.mxu1 %v599_v0 }
  0x2f   :  { %510 = vmatpush3.msra.mxu0 %v50_v25  ;;  %543 = vmatpush3.msra.mxu1 %v67_v40 }
  0x30   :  { %511 = vmatprep.subr.mxu0 %v599_v0  ;;  %544 = vmatprep.subr.mxu1 %v599_v0 }
  0x31   :  { %512 = vmatpush3.msra.mxu0 %v49_v26  ;;  %545 = vmatpush3.msra.mxu1 %v66_v41 }
  0x32   :  { %513 = vmatprep.subr.mxu0 %v599_v0  ;;  %546 = vmatprep.subr.mxu1 %v599_v0 }
  0x33   :  { %514 = vmatpush3.msra.mxu0 %v48_v27  ;;  %547 = vmatpush3.msra.mxu1 %v65_v42 }
  0x34   :  { %515 = vmatprep.subr.mxu0 %v599_v0  ;;  %548 = vmatprep.subr.mxu1 %v599_v0 }
  0x35   :  { %516 = vmatpush3.msra.mxu0 %v47_v28  ;;  %549 = vmatpush3.msra.mxu1 %v64_v43 }
  0x36   :  { %517 = vmatprep.subr.mxu0 %v599_v0  ;;  %550 = vmatprep.subr.mxu1 %v599_v0 }
  0x37   :  { %518 = vmatpush3.msra.mxu0 %v46_v29  ;;  %551 = vmatpush3.msra.mxu1 %v63_v44 }
  0x38   :  { %519 = vmatprep.subr.mxu0 %v599_v0  ;;  %552 = vmatprep.subr.mxu1 %v599_v0 }
  0x39   :  { %520 = vmatpush3.msra.mxu0 %v45_v30  ;;  %553 = vmatpush3.msra.mxu1 %v62_v45 }
  0x3a   :  { %521 = vmatprep.subr.mxu0 %v599_v0  ;;  %554 = vmatprep.subr.mxu1 %v599_v0 }
  0x3b   :  { %522 = vmatpush3.msra.mxu0 %v44_v31  ;;  %555 = vmatpush3.msra.mxu1 %v61_v46 }
  0x3c   :  { %523 = vmatprep.subr.mxu0 %v599_v0  ;;  %556 = vmatprep.subr.mxu1 %v599_v0 }
  0x3d   :  { %524 = vmatpush3.msra.mxu0 %v43_v32  ;;  %557 = vmatpush3.msra.mxu1 %v60_v55 }
  0x3e   :  { %525 = vmatprep.subr.mxu0 %v599_v0  ;;  %558 = vmatprep.subr.mxu1 %v599_v0 }
  0x3f   :  { %526 = vmatpush3.msra.mxu0 %v42_v33  ;;  %559 = vmatpush3.msra.mxu1 %v59_v56 }
  0x40   :  { %560 = vmatprep.subr.mxu1 %v599_v0 }
  0x41   :  { %561 = vmatpush3.msra.mxu1 %v58_v57 }
  0xdf   :  { %v148_v47 = vpop.f32.mrf.mxu0  ;;  %v218_v49 = vpop.f32.mrf.mxu1 }
  0xe0   :  { %v222_v50 = vmax.f32 %v148_v47, %v218_v49 }
  0xe1   :  { %v475_v51 = vpop.f32.mrf.mxu0  ;;  %v494_v52 = vpop.f32.mrf.mxu1 }
  0xe2   :  { %v227_v53 = vadd.f32 %v401_v48, %v222_v50 }
  0xe4   :  { %v228_v54 = vmax.f32 %v227_v53, 0.0 }
  0xe6   :  { %528 = vmatmul.mubr.f32.vlgmr.msra.gmra.mxu0 %v228_v54 }
 0x1a6   :  { %v299_v59 = vpop.f32.mrf.mxu0 }
 0x1a7   :  { %v300_v60 = vadd.f32 %v402_v58, %v299_v59 }
 0x1a8   :  { %v529_v61 = vpop.f32.mrf.mxu0 }
 0x1a9   :  { %v303_v62 = vmax.f32 %v300_v60, 0.0 }
 0x1ab   :  { %563 = vmatmul.mubr.f32.vlgmr.msra.gmra.mxu1 %v303_v62 }
 0x26b   :  { %v374_v1 = vpop.f32.mrf.mxu1 }
 0x26c   :  { %v375_v2 = vadd.f32 %v403_v63, %v374_v1 }
 0x26d   :  { %v564_v3 = vpop.f32.mrf.mxu1 }
 0x26e   :  { %v378_v5 = vmax.f32 %v375_v2, 0.0 }
 0x270   :  { %v383_v6 = vadd.f32 %v404_v4, %v378_v5 }
 0x272   :  { %384 = vmax.xlane.f32.xlu0 %v383_v6 }
 0x2fb   :  { %v385_v7 = vpop.xlane.xlu0 %384 }
 0x2fc   :  { %v386_v8 = vsub.f32 %v383_v6, %v385_v7 }
 0x2fe   :  { %v387_v9 = vmul.f32 1.442695, %v386_v8 }
 0x300   :  { %570 = vpow2.f32 %v387_v9 }
 0x30d   :  { %v571_v0 = vpop.eup %570 }
 0x30e   :  { %389 = vadd.xlane.f32.xlu0 %v571_v0 }
 0x397   :  { %v390_v10 = vpop.xlane.xlu0 %389 }
 0x398   :  { %572 = vrcp.f32 %v390_v10 }
 0x3a5   :  { %v573_v11 = vpop.eup %572 }
 0x3a6   :  { %v392_v12 = vmul.f32 %v573_v11, %v571_v0 }
 0x3a8   :  { %393 = vst [vmem:[%s683_s2] sm:$0xff] %v392_v12 }
 0x3a9   :  { %398 = vsyncpa [#allocation3], 1 }

</bundles_post_ra>
